<compile_context>
chip_gen: v6e
topology: v6e:2x2x1
jax: 0.10.0
libtpu: 0.0.40
codegen_flags: <defaults>
</compile_context>

<pallas_src>
import functools

import jax
import jax.numpy as jnp
from jax.experimental import pallas as pl
from jax.experimental.pallas import tpu as pltpu


def regression_net_kernel(x_ref, w1_ref, b1_ref, w2_ref, b2_ref,
                          wh_ref, bh_ref, *rest,
                          in_dim, out_dim, training, matmul_dtype):
    """Feature-major fused forward.

    Shapes (per batch tile TB):
      x:      (in_dim, TB)
      w1, b1: (128, in_dim), (128, 1)
      w2, b2: (64, 128),     (64, 1)
      wh, bh: (2*out_dim, 64), (2*out_dim, 1)     [mean head ++ scale head]
      masks (training only): (128, TB), (64, TB)  (0 or 1/(1-p), pre-scaled)
      out:    (2*out_dim, TB)  rows [0:out_dim] = mean, rows [out_dim:] = scale
    """
    if training:
        m1_ref, m2_ref, out_ref = rest
    else:
        (out_ref,) = rest

    x = x_ref[...]  # (in_dim, TB) float32

    # ---- layer 1: (128, in_dim) @ (in_dim, TB) ----
    if in_dim == 1:
        # K=1 "matmul" is just a broadcast multiply: keep it on the VPU.
        h1 = w1_ref[...] * x + b1_ref[...]
    else:
        h1 = jnp.dot(w1_ref[...].astype(matmul_dtype), x.astype(matmul_dtype),
                     preferred_element_type=jnp.float32) + b1_ref[...]
    h1 = jnp.maximum(h1, 0.0)
    if training:
        h1 = h1 * m1_ref[...]          # inverted dropout (mask pre-scaled)

    # ---- layer 2: (64, 128) @ (128, TB) ----
    h2 = jnp.dot(w2_ref[...].astype(matmul_dtype), h1.astype(matmul_dtype),
                 preferred_element_type=jnp.float32) + b2_ref[...]
    h2 = jnp.maximum(h2, 0.0)
    if training:
        h2 = h2 * m2_ref[...]

    # ---- fused heads: (2*out_dim, 64) @ (64, TB) ----
    z = jnp.dot(wh_ref[...].astype(matmul_dtype), h2.astype(matmul_dtype),
                preferred_element_type=jnp.float32) + bh_ref[...]

    # rows [0:out_dim] are the mean head; rows [out_dim:] are the scale head,
    # where scale = sqrt(exp(s)) == exp(0.5 * s) (numerically stable form).
    row = jax.lax.broadcasted_iota(jnp.int32, z.shape, 0)
    out = jnp.where(row < out_dim, z, jnp.exp(0.5 * z))
    out_ref[...] = out.astype(out_ref.dtype)


def regression_net_forward(x, params, *, dropout_p=0.5, training=False,
                           rng_key=None, block_batch=4096,
                           matmul_dtype=jnp.bfloat16):
    """Fused RegressionNet forward.

    x: (N, in_dim) float32.  params use torch layout: w (out, in), b (out,).
    `training=True` also covers torch's `dropout_at_eval=True` case.
    Returns (mean, scale), each (N, out_dim) float32.
    """
    x = jnp.asarray(x, jnp.float32)
    N, in_dim = x.shape
    h1_dim = params["w1"].shape[0]
    h2_dim = params["w2"].shape[0]
    out_dim = params["wh"].shape[0]
    training = bool(training)

    # ---- feature-major operands (lane axis = batch) ----
    x_fm = x.T                                                     # (in_dim, N)
    w1 = params["w1"]                                              # (128, in_dim)
    b1 = params["b1"][:, None]                                     # (128, 1)
    w2 = params["w2"]                                              # (64, 128)
    b2 = params["b2"][:, None]                                     # (64, 1)
    w_head = jnp.concatenate([params["wh"], params["ws"]], axis=0)  # (2*out_dim, 64)
    b_head = jnp.concatenate([params["bh"], params["bs"]], axis=0)[:, None]

    # ---- batch tile: full batch if small, else a 128-aligned tile ----
    if N <= block_batch:
        tb = N
    else:
        tb = max(128, (block_batch // 128) * 128)
    grid = (pl.cdiv(N, tb),)

    const_map = lambda i: (0, 0)       # weights/biases stay resident
    batch_map = lambda i: (0, i)       # batch-tiled operands

    in_specs = [
        pl.BlockSpec((in_dim, tb), batch_map),
        pl.BlockSpec(w1.shape, const_map),
        pl.BlockSpec(b1.shape, const_map),
        pl.BlockSpec(w2.shape, const_map),
        pl.BlockSpec(b2.shape, const_map),
        pl.BlockSpec(w_head.shape, const_map),
        pl.BlockSpec(b_head.shape, const_map),
    ]
    args = [x_fm, w1, b1, w2, b2, w_head, b_head]

    if training:
        # Host-generated inverted-dropout keep masks (0 or 1/(1-p)); each batch
        # tile reads its own slice via the BlockSpec, so tiles get independent
        # masks. Same Bernoulli(1-p) + 1/(1-p) rescale semantics as F.dropout
        # (different RNG stream than torch, which is expected for a stochastic op).
        if rng_key is None:
            rng_key = jax.random.PRNGKey(0)
        k1, k2 = jax.random.split(rng_key)
        keep_scale = 1.0 / (1.0 - dropout_p)
        m1 = jax.random.bernoulli(k1, 1.0 - dropout_p,
                                  (h1_dim, N)).astype(jnp.float32) * keep_scale
        m2 = jax.random.bernoulli(k2, 1.0 - dropout_p,
                                  (h2_dim, N)).astype(jnp.float32) * keep_scale
        in_specs += [pl.BlockSpec((h1_dim, tb), batch_map),
                     pl.BlockSpec((h2_dim, tb), batch_map)]
        args += [m1, m2]

    kernel = functools.partial(
        regression_net_kernel,
        in_dim=in_dim, out_dim=out_dim, training=training,
        matmul_dtype=matmul_dtype)

    out = pl.pallas_call(
        kernel,
        out_shape=jax.ShapeDtypeStruct((2 * out_dim, N), jnp.float32),
        grid=grid,
        in_specs=in_specs,
        out_specs=pl.BlockSpec((2 * out_dim, tb), batch_map),
        compiler_params=pltpu.CompilerParams(
            dimension_semantics=("parallel",)),
    )(*args)

    mean = out[:out_dim, :].T           # (N, out_dim)
    scale = out[out_dim:, :].T          # (N, out_dim)
    return mean, scale


def init_params(key, in_dim=1, out_dim=1):
    """nn.Linear-style init (torch layout: w (out, in), b (out,))."""
    def linear(k, fan_in, fan_out):
        kw, kb = jax.random.split(k)
        bound = 1.0 / (fan_in ** 0.5)
        w = jax.random.uniform(kw, (fan_out, fan_in), jnp.float32, -bound, bound)
        b = jax.random.uniform(kb, (fan_out,), jnp.float32, -bound, bound)
        return w, b

    k1, k2, k3, k4 = jax.random.split(key, 4)
    w1, b1 = linear(k1, in_dim, 128)
    w2, b2 = linear(k2, 128, 64)
    wh, bh = linear(k3, 64, out_dim)
    ws, bs = linear(k4, 64, out_dim)
    return {"w1": w1, "b1": b1, "w2": w2, "b2": b2,
            "wh": wh, "bh": bh, "ws": ws, "bs": bs}


if __name__ == "__main__":
    key = jax.random.PRNGKey(0)
    kp, kx = jax.random.split(key)

    in_dim, out_dim, batch = 1, 1, 8
    params = init_params(kp, in_dim=in_dim, out_dim=out_dim)
    x = jax.random.normal(kx, (batch, in_dim), dtype=jnp.float32)

    # Pure-JAX eval-mode reference (torch layout: y = x @ W.T + b).
    h1_ref = jnp.maximum(x @ params["w1"].T + params["b1"], 0.0)
    h2_ref = jnp.maximum(h1_ref @ params["w2"].T + params["b2"], 0.0)
    mean_ref = h2_ref @ params["wh"].T + params["bh"]
    scale_ref = jnp.exp(0.5 * (h2_ref @ params["ws"].T + params["bs"]))

    # 1) Eval mode, exact f32 matmuls: tight correctness check.
    mean_f32, scale_f32 = regression_net_forward(
        x, params, dropout_p=0.5, training=False, matmul_dtype=jnp.float32)
    jax.block_until_ready((mean_f32, scale_f32))
    assert jnp.allclose(mean_f32, mean_ref, atol=1e-5, rtol=1e-5)
    assert jnp.allclose(scale_f32, scale_ref, atol=1e-5, rtol=1e-5)

    # 2) Eval mode, default bf16-MXU path: relaxed tolerance sanity check.
    mean_bf, scale_bf = regression_net_forward(
        x, params, dropout_p=0.5, training=False)
    jax.block_until_ready((mean_bf, scale_bf))
    assert jnp.allclose(mean_bf, mean_ref, atol=5e-2, rtol=5e-2)
    assert jnp.allclose(scale_bf, scale_ref, atol=5e-2, rtol=5e-2)

    # 3) Training mode (dropout active), f32 matmuls: check against a reference
    #    that rebuilds the exact same keep-masks from the same key.
    rng = jax.random.PRNGKey(42)
    mean_t, scale_t = regression_net_forward(
        x, params, dropout_p=0.5, training=True, rng_key=rng,
        matmul_dtype=jnp.float32)
    jax.block_until_ready((mean_t, scale_t))

    k1, k2 = jax.random.split(rng)
    m1 = jax.random.bernoulli(k1, 0.5, (128, batch)).astype(jnp.float32) * 2.0
    m2 = jax.random.bernoulli(k2, 0.5, (64, batch)).astype(jnp.float32) * 2.0
    h1_t = jnp.maximum(x @ params["w1"].T + params["b1"], 0.0) * m1.T
    h2_t = jnp.maximum(h1_t @ params["w2"].T + params["b2"], 0.0) * m2.T
    mean_t_ref = h2_t @ params["wh"].T + params["bh"]
    scale_t_ref = jnp.exp(0.5 * (h2_t @ params["ws"].T + params["bs"]))
    assert mean_t.shape == (batch, out_dim) and scale_t.shape == (batch, out_dim)
    assert jnp.allclose(mean_t, mean_t_ref, atol=1e-5, rtol=1e-5)
    assert jnp.allclose(scale_t, scale_t_ref, atol=1e-5, rtol=1e-5)
    assert bool(jnp.all(jnp.isfinite(mean_t))) and bool(jnp.all(scale_t > 0))

    print("KERNEL_OK")
</pallas_src>

<mosaic_0001>
module attributes {stable_mosaic.version = 11 : i64} {
  func.func @regression_net_kernel(%arg0: i32, %arg1: memref<1x8xf32, #tpu.memory_space<vmem>>, %arg2: memref<128x1xf32, #tpu.memory_space<vmem>>, %arg3: memref<128x1xf32, #tpu.memory_space<vmem>>, %arg4: memref<64x128xf32, #tpu.memory_space<vmem>>, %arg5: memref<64x1xf32, #tpu.memory_space<vmem>>, %arg6: memref<2x64xf32, #tpu.memory_space<vmem>>, %arg7: memref<2x1xf32, #tpu.memory_space<vmem>>, %arg8: memref<2x8xf32, #tpu.memory_space<vmem>>) attributes {dimension_semantics = [#tpu.dimension_semantics<parallel>], iteration_bounds = array<i64: 1>, scalar_prefetch = 0 : i64, scratch_operands = 0 : i64, tpu.core_type = #tpu.core_type<tc>, window_params = [{transform_indices = @transform_0, window_bounds = array<i64: 1, 8>}, {pipeline_mode = #tpu.pipeline_mode<synchronous>, transform_indices = @transform_1, window_bounds = array<i64: 128, 1>}, {pipeline_mode = #tpu.pipeline_mode<synchronous>, transform_indices = @transform_2, window_bounds = array<i64: 128, 1>}, {pipeline_mode = #tpu.pipeline_mode<synchronous>, transform_indices = @transform_3, window_bounds = array<i64: 64, 128>}, {pipeline_mode = #tpu.pipeline_mode<synchronous>, transform_indices = @transform_4, window_bounds = array<i64: 64, 1>}, {pipeline_mode = #tpu.pipeline_mode<synchronous>, transform_indices = @transform_5, window_bounds = array<i64: 2, 64>}, {pipeline_mode = #tpu.pipeline_mode<synchronous>, transform_indices = @transform_6, window_bounds = array<i64: 2, 1>}, {transform_indices = @transform_7, window_bounds = array<i64: 2, 8>}]} {
    %c0 = arith.constant 0 : index
    %c0_0 = arith.constant 0 : index
    %0 = vector.load %arg1[%c0, %c0_0] : memref<1x8xf32, #tpu.memory_space<vmem>>, vector<1x8xf32>
    %c0_1 = arith.constant 0 : index
    %c0_2 = arith.constant 0 : index
    %1 = vector.load %arg2[%c0_1, %c0_2] : memref<128x1xf32, #tpu.memory_space<vmem>>, vector<128x1xf32>
    %2 = vector.broadcast %1 : vector<128x1xf32> to vector<128x8xf32>
    %3 = vector.broadcast %0 : vector<1x8xf32> to vector<128x8xf32>
    %4 = arith.mulf %2, %3 : vector<128x8xf32>
    %c0_3 = arith.constant 0 : index
    %c0_4 = arith.constant 0 : index
    %5 = vector.load %arg3[%c0_3, %c0_4] : memref<128x1xf32, #tpu.memory_space<vmem>>, vector<128x1xf32>
    %6 = vector.broadcast %5 : vector<128x1xf32> to vector<128x8xf32>
    %7 = arith.addf %4, %6 : vector<128x8xf32>
    %cst = arith.constant 0.000000e+00 : f32
    %8 = vector.broadcast %cst : f32 to vector<128x8xf32>
    %9 = arith.maximumf %7, %8 : vector<128x8xf32>
    %c0_5 = arith.constant 0 : index
    %c0_6 = arith.constant 0 : index
    %10 = vector.load %arg4[%c0_5, %c0_6] : memref<64x128xf32, #tpu.memory_space<vmem>>, vector<64x128xf32>
    %cst_7 = arith.constant dense<0.000000e+00> : vector<64x8xf32>
    %11 = tpu.matmul %10, %9, %cst_7 {dimension_numbers = #tpu.dot_dimension_numbers<[1], [0], [0], [1], [0, 0, 1, 1], [], []>} : vector<64x128xf32>, vector<128x8xf32>, vector<64x8xf32> -> vector<64x8xf32>
    %c0_8 = arith.constant 0 : index
    %c0_9 = arith.constant 0 : index
    %12 = vector.load %arg5[%c0_8, %c0_9] : memref<64x1xf32, #tpu.memory_space<vmem>>, vector<64x1xf32>
    %13 = vector.broadcast %12 : vector<64x1xf32> to vector<64x8xf32>
    %14 = arith.addf %11, %13 : vector<64x8xf32>
    %cst_10 = arith.constant 0.000000e+00 : f32
    %15 = vector.broadcast %cst_10 : f32 to vector<64x8xf32>
    %16 = arith.maximumf %14, %15 : vector<64x8xf32>
    %c0_11 = arith.constant 0 : index
    %c0_12 = arith.constant 0 : index
    %17 = vector.load %arg6[%c0_11, %c0_12] : memref<2x64xf32, #tpu.memory_space<vmem>>, vector<2x64xf32>
    %cst_13 = arith.constant dense<0.000000e+00> : vector<2x8xf32>
    %18 = tpu.matmul %17, %16, %cst_13 {dimension_numbers = #tpu.dot_dimension_numbers<[1], [0], [0], [1], [0, 0, 1, 1], [], []>} : vector<2x64xf32>, vector<64x8xf32>, vector<2x8xf32> -> vector<2x8xf32>
    %c0_14 = arith.constant 0 : index
    %c0_15 = arith.constant 0 : index
    %19 = vector.load %arg7[%c0_14, %c0_15] : memref<2x1xf32, #tpu.memory_space<vmem>>, vector<2x1xf32>
    %20 = vector.broadcast %19 : vector<2x1xf32> to vector<2x8xf32>
    %21 = arith.addf %18, %20 : vector<2x8xf32>
    %22 = tpu.iota {dimensions = array<i32: 0>} : vector<2x8xi32>
    %c1_i32 = arith.constant 1 : i32
    %23 = vector.broadcast %c1_i32 : i32 to vector<2x8xi32>
    %24 = arith.cmpi slt, %22, %23 : vector<2x8xi32>
    %cst_16 = arith.constant 5.000000e-01 : f32
    %25 = vector.broadcast %cst_16 : f32 to vector<2x8xf32>
    %26 = arith.mulf %25, %21 : vector<2x8xf32>
    %27 = math.exp %26 : vector<2x8xf32>
    %28 = arith.select %24, %21, %27 : vector<2x8xi1>, vector<2x8xf32>
    %c0_17 = arith.constant 0 : index
    %c0_18 = arith.constant 0 : index
    %29 = vector.load %arg8[%c0_17, %c0_18] : memref<2x8xf32, #tpu.memory_space<vmem>>, vector<2x8xf32>
    tpu.vector_store %arg8[%c0_17, %c0_18], %28 {strides = array<i32>} : memref<2x8xf32, #tpu.memory_space<vmem>>, vector<2x8xf32>,
    return
  }
  func.func @transform_0(%arg0: i32) -> (i32, i32) {
    %c0_i32 = arith.constant 0 : i32
    %c0_i32_0 = arith.constant 0 : i32
    return %c0_i32, %arg0 : i32, i32
  }
  func.func @transform_1(%arg0: i32) -> (i32, i32) {
    %c0_i32 = arith.constant 0 : i32
    %c0_i32_0 = arith.constant 0 : i32
    %c0_i32_1 = arith.constant 0 : i32
    return %c0_i32, %c0_i32_0 : i32, i32
  }
  func.func @transform_2(%arg0: i32) -> (i32, i32) {
    %c0_i32 = arith.constant 0 : i32
    %c0_i32_0 = arith.constant 0 : i32
    %c0_i32_1 = arith.constant 0 : i32
    return %c0_i32, %c0_i32_0 : i32, i32
  }
  func.func @transform_3(%arg0: i32) -> (i32, i32) {
    %c0_i32 = arith.constant 0 : i32
    %c0_i32_0 = arith.constant 0 : i32
    %c0_i32_1 = arith.constant 0 : i32
    return %c0_i32, %c0_i32_0 : i32, i32
  }
  func.func @transform_4(%arg0: i32) -> (i32, i32) {
    %c0_i32 = arith.constant 0 : i32
    %c0_i32_0 = arith.constant 0 : i32
    %c0_i32_1 = arith.constant 0 : i32
    return %c0_i32, %c0_i32_0 : i32, i32
  }
  func.func @transform_5(%arg0: i32) -> (i32, i32) {
    %c0_i32 = arith.constant 0 : i32
    %c0_i32_0 = arith.constant 0 : i32
    %c0_i32_1 = arith.constant 0 : i32
    return %c0_i32, %c0_i32_0 : i32, i32
  }
  func.func @transform_6(%arg0: i32) -> (i32, i32) {
    %c0_i32 = arith.constant 0 : i32
    %c0_i32_0 = arith.constant 0 : i32
    %c0_i32_1 = arith.constant 0 : i32
    return %c0_i32, %c0_i32_0 : i32, i32
  }
  func.func @transform_7(%arg0: i32) -> (i32, i32) {
    %c0_i32 = arith.constant 0 : i32
    %c0_i32_0 = arith.constant 0 : i32
    return %c0_i32, %arg0 : i32, i32
  }
}

</mosaic_0001>

<bundles_post_ra>
// kernel: tpu_custom_call.1
= control target key start
LH: loop header
LB: loop body
LE: loop exit
PB: predicated region body
PF: predicated region fallthrough
CT: control target
= control target key end

     0   :  { %v675_v2 = vmov 0   ;;  %s893_s0 = inlined_call_operand.vmem [shape: f32[1,8], index: 0, kind: input, shape index: {}]   ;;  %s894_s1 = inlined_call_operand.vmem [shape: f32[128,1], index: 1, kind: input, shape index: {}]   ;;  %s895_s2 = inlined_call_operand.vmem [shape: f32[128,1], index: 2, kind: input, shape index: {}]   ;;  %s896_s3 = inlined_call_operand.vmem [shape: f32[64,128], index: 3, kind: input, shape index: {}]   ;;  %s897_s4 = inlined_call_operand.vmem [shape: f32[64,1], index: 4, kind: input, shape index: {}]   ;;  %s898_s5 = inlined_call_operand.vmem [shape: f32[2,64], index: 5, kind: input, shape index: {}]   ;;  %s899_s6 = inlined_call_operand.vmem [shape: f32[2,1], index: 6, kind: input, shape index: {}]   ;;  %s900_s7 = inlined_call_operand.hbm [shape: f32[2,8], index: 7, kind: output, shape index: {}]  }
   0x1   :  { %v161_v0 = vld [vmem:[%s895_s2 + $0x78] sm:$0xff]  ;;  %650 = vset.pattern.permute.xlu1 %v675_v2  ;;  %649 = vset.pattern.permute.xlu0 %v675_v2  ;;  %v42_v3 = vld [vmem:[%s894_s1 + $0x70] sm:$0xff]  ;;  %v41_v4 = vld [vmem:[%s894_s1 + $0x68] sm:$0xff] }
   0x2   :  { %v43_v1 = vld [vmem:[%s894_s1 + $0x78] sm:$0xff]  ;;  %239 = vperm.xlu1 %650, %v161_v0   ;;  %v160_v5 = vld [vmem:[%s895_s2 + $0x70] sm:$0xff]  ;;  %v40_v6 = vld [vmem:[%s894_s1 + $0x60] sm:$0xff] }
   0x3   :  { %121 = vperm.xlu0 %649, %v43_v1   ;;  %v159_v7 = vld [vmem:[%s895_s2 + $0x68] sm:$0xff]  ;;  %v39_v8 = vld [vmem:[%s894_s1 + $0x58] sm:$0xff] }
   0x6   :  { %111 = vperm.xlu1 %650, %v41_v4  }
   0x7   :  { %116 = vperm.xlu0 %649, %v42_v3  }
   0xa   :  { %106 = vperm.xlu1 %650, %v40_v6  }
   0xb   :  { %234 = vperm.xlu0 %649, %v160_v5  }
   0xe   :  { %101 = vperm.xlu1 %650, %v39_v8  }
   0xf   :  { %229 = vperm.xlu0 %649, %v159_v7  }
  0x10   :  { %12 = vsyncpa [#allocation3], 0  ;;  %v158_v9 = vld [vmem:[%s895_s2 + $0x60] sm:$0xff]  ;;  %v38_v10 = vld [vmem:[%s894_s1 + $0x50] sm:$0xff]  ;;  %vm677_vm0 = vmmov 0   ;;  %vm450_vm1 = vcmask 523264  }
  0x11   :  { %v157_v11 = vld [vmem:[%s895_s2 + $0x58] sm:$0xff]  ;;  %v37_v12 = vld [vmem:[%s894_s1 + $0x48] sm:$0xff]  ;;  %v156_v13 = vld [vmem:[%s895_s2 + $0x50] sm:$0xff]  ;;  %s678_s26 = smov [#allocation2]   ;;  %vm531_vm3 = vcmask 58368  }
  0x12   :  { %96 = vperm.xlu1 %650, %v38_v10   ;;  %v36_v14 = vld [vmem:[%s894_s1 + $0x40] sm:$0xff]  ;;  %v155_v15 = vld [vmem:[%s895_s2 + $0x48] sm:$0xff]  ;;  %v35_v16 = vld [vmem:[%s894_s1 + $0x38] sm:$0xff]  ;;  %s539_s27 = sshll.u32 %s678_s26, 4  ;;  %s540_s27 = int_to_ptr.vmem [resolvable:$true] %s539_s27 }
  0x13   :  { %224 = vperm.xlu0 %649, %v158_v9   ;;  %v154_v17 = vld [vmem:[%s895_s2 + $0x40] sm:$0xff]  ;;  %v34_v18 = vld [vmem:[%s894_s1 + $0x30] sm:$0xff]  ;;  %v153_v19 = vld [vmem:[%s895_s2 + $0x38] sm:$0xff]  ;;  %p658_p1 = scmp.lt.s32.totalorder %s540_s27, %s540_s27 }
  0x14   :  { %v33_v20 = vld [vmem:[%s894_s1 + $0x28] sm:$0xff]  ;;  %v152_v21 = vld [vmem:[%s895_s2 + $0x30] sm:$0xff]  ;;  %v32_v22 = vld [vmem:[%s894_s1 + $0x20] sm:$0xff] }
  0x15   :  { %v151_v23 = vld [vmem:[%s895_s2 + $0x28] sm:$0xff]  ;;  %v31_v24 = vld [vmem:[%s894_s1 + $0x18] sm:$0xff]  ;;  %v150_v25 = vld [vmem:[%s895_s2 + $0x20] sm:$0xff] }
  0x16   :  { %91 = vperm.xlu1 %650, %v37_v12   ;;  %v30_v26 = vld [vmem:[%s894_s1 + $0x10] sm:$0xff]  ;;  %v149_v27 = vld [vmem:[%s895_s2 + $0x18] sm:$0xff]  ;;  %v29_v28 = vld [vmem:[%s894_s1 + $0x8] sm:$0xff] }
  0x17   :  { %219 = vperm.xlu0 %649, %v157_v11   ;;  %v148_v29 = vld [vmem:[%s895_s2 + $0x10] sm:$0xff]  ;;  %v28_v30 = vld [vmem:[%s894_s1] sm:$0xff]  ;;  %v147_v31 = vld [vmem:[%s895_s2 + $0x8] sm:$0xff] }
  0x18   :  { %v146_v32 = vld [vmem:[%s895_s2] sm:$0xff]  ;;  %v289_v33 = vld [vmem:[%s897_s4 + $0x38] sm:$0xff]  ;;  %v288_v34 = vld [vmem:[%s897_s4 + $0x30] sm:$0xff] }
  0x19   :  { %v274_v35 = vld [vmem:[%s896_s3] sm:$0xff]  ;;  %v287_v36 = vld [vmem:[%s897_s4 + $0x28] sm:$0xff]  ;;  %v285_v38 = vld [vmem:[%s897_s4 + $0x18] sm:$0xff] }
  0x1a   :  { %86 = vperm.xlu1 %650, %v36_v14   ;;  %614 = vmatprep.mubr.f32.mxu0 %v274_v35  ;;  %v286_v37 = vld [vmem:[%s897_s4 + $0x20] sm:$0xff]  ;;  %v284_v39 = vld [vmem:[%s897_s4 + $0x10] sm:$0xff]  ;;  %v283_v40 = vld [vmem:[%s897_s4 + $0x8] sm:$0xff] }
  0x1b   :  { %214 = vperm.xlu0 %649, %v156_v13   ;;  %v282_v41 = vld [vmem:[%s897_s4] sm:$0xff] }
  0x1c   :  { %v444_v42 = vld [vmem:[%s899_s6] sm:$0x3] }
  0x1d   :  { %v848_v43 = vld [vmem:[%s893_s0] ss:$0 sm:$0xff] }
  0x1e   :  { %81 = vperm.xlu1 %650, %v35_v16  }
  0x1f   :  { %209 = vperm.xlu0 %649, %v155_v15  }
  0x22   :  { %76 = vperm.xlu1 %650, %v34_v18  }
  0x23   :  { %204 = vperm.xlu0 %649, %v154_v17  }
  0x26   :  { %71 = vperm.xlu1 %650, %v33_v20  }
  0x27   :  { %199 = vperm.xlu0 %649, %v153_v19  }
  0x2a   :  { %66 = vperm.xlu1 %650, %v32_v22  }
  0x2b   :  { %194 = vperm.xlu0 %649, %v152_v21  }
  0x2e   :  { %61 = vperm.xlu1 %650, %v31_v24  }
  0x2f   :  { %189 = vperm.xlu0 %649, %v151_v23  }
  0x32   :  { %56 = vperm.xlu1 %650, %v30_v26  }
  0x33   :  { %184 = vperm.xlu0 %649, %v150_v25  }
  0x36   :  { %51 = vperm.xlu1 %650, %v29_v28  }
  0x37   :  { %179 = vperm.xlu0 %649, %v149_v27  }
  0x3a   :  { %46 = vperm.xlu1 %650, %v28_v30  }
  0x3b   :  { %174 = vperm.xlu0 %649, %v148_v29  }
  0x3e   :  { %164 = vperm.xlu1 %650, %v146_v32  }
  0x3f   :  { %169 = vperm.xlu0 %649, %v147_v31  }
  0x42   :  { %322 = vperm.xlu1 %650, %v288_v34  }
  0x43   :  { %327 = vperm.xlu0 %649, %v289_v33  }
  0x46   :  { %312 = vperm.xlu1 %650, %v286_v37  }
  0x47   :  { %317 = vperm.xlu0 %649, %v287_v36  }
  0x4a   :  { %302 = vperm.xlu1 %650, %v284_v39  }
  0x4b   :  { %307 = vperm.xlu0 %649, %v285_v38  }
  0x4e   :  { %292 = vperm.xlu1 %650, %v282_v41  }
  0x4f   :  { %297 = vperm.xlu0 %649, %v283_v40  }
  0x53   :  { %447 = vperm.xlu0 %649, %v444_v42  }
  0x7d   :  { %v240_v44 = vpop.permute.xlu1 %239 }
  0x7e   :  { %v122_v45 = vpop.permute.xlu0 %121 }
  0x7f   :  { %v145_v46 = vmul.f32 %v848_v43, %v122_v45 }
  0x81   :  { %v257_v47 = vadd.f32 %v240_v44, %v145_v46  ;;  %v112_v49 = vpop.permute.xlu1 %111 }
  0x82   :  { %v117_v48 = vpop.permute.xlu0 %116  ;;  %v143_v55 = vmul.f32 %v848_v43, %v112_v49 }
  0x83   :  { %v273_v50 = vmax.f32 %v257_v47, 0.0  ;;  %v144_v51 = vmul.f32 %v848_v43, %v117_v48 }
  0x85   :  { %582 = vmatprep.subr.mxu0 %v273_v50  ;;  %v107_v53 = vpop.permute.xlu1 %106 }
  0x86   :  { %v235_v52 = vpop.permute.xlu0 %234  ;;  %583 = vmatpush3.msra.mxu0 %v273_v50  ;;  %v142_v60 = vmul.f32 %v848_v43, %v107_v53 }
  0x87   :  { %v256_v54 = vadd.f32 %v235_v52, %v144_v51 }
  0x89   :  { %v272_v56 = vmax.f32 %v256_v54, 0.0  ;;  %v102_v58 = vpop.permute.xlu1 %101 }
  0x8a   :  { %v230_v57 = vpop.permute.xlu0 %229  ;;  %v141_v1 = vmul.f32 %v848_v43, %v102_v58 }
  0x8b   :  { %v255_v59 = vadd.f32 %v230_v57, %v143_v55  ;;  %584 = vmatprep.subr.mxu0 %v272_v56 }
  0x8c   :  { %585 = vmatpush3.msra.mxu0 %v272_v56 }
  0x8d   :  { %v271_v61 = vmax.f32 %v255_v59, 0.0  ;;  %v97_v63 = vpop.permute.xlu1 %96 }
  0x8e   :  { %v225_v62 = vpop.permute.xlu0 %224  ;;  %v140_v6 = vmul.f32 %v848_v43, %v97_v63  ;;  %v278_v63 = vld [vmem:[%s896_s3 + $0x20] sm:$0xff] }
  0x8f   :  { %v254_v0 = vadd.f32 %v225_v62, %v142_v60  ;;  %586 = vmatprep.subr.mxu0 %v271_v61  ;;  %v276_v62 = vld [vmem:[%s896_s3 + $0x10] sm:$0xff] }
  0x90   :  { %587 = vmatpush3.msra.mxu0 %v271_v61  ;;  %v275_v61 = vld [vmem:[%s896_s3 + $0x8] sm:$0xff] }
  0x91   :  { %v270_v2 = vmax.f32 %v254_v0, 0.0  ;;  %v92_v4 = vpop.permute.xlu1 %91  ;;  %v279_v0 = vld [vmem:[%s896_s3 + $0x28] sm:$0xff] }
  0x92   :  { %v220_v3 = vpop.permute.xlu0 %219  ;;  %v139_v11 = vmul.f32 %v848_v43, %v92_v4 }
  0x93   :  { %v253_v5 = vadd.f32 %v220_v3, %v141_v1  ;;  %588 = vmatprep.subr.mxu0 %v270_v2  ;;  %v280_v1 = vld [vmem:[%s896_s3 + $0x30] sm:$0xff]  ;;  %v676_v3 = vmov 0.0  }
  0x94   :  { %589 = vmatpush3.msra.mxu0 %v270_v2  ;;  %v281_v2 = vld [vmem:[%s896_s3 + $0x38] sm:$0xff]  ;;  %626 = vmatprep.subr.mxu1 %v676_v3 }
  0x95   :  { %v269_v7 = vmax.f32 %v253_v5, 0.0  ;;  %v87_v9 = vpop.permute.xlu1 %86  ;;  %642 = vmatprep.mubr.msk.f32.mxu1 %vm677_vm0, %v676_v3 }
  0x96   :  { %v215_v8 = vpop.permute.xlu0 %214  ;;  %v138_v16 = vmul.f32 %v848_v43, %v87_v9 }
  0x97   :  { %v252_v10 = vadd.f32 %v215_v8, %v140_v6  ;;  %590 = vmatprep.subr.mxu0 %v269_v7 }
  0x98   :  { %591 = vmatpush3.msra.mxu0 %v269_v7 }
  0x99   :  { %v268_v12 = vmax.f32 %v252_v10, 0.0  ;;  %v82_v14 = vpop.permute.xlu1 %81 }
  0x9a   :  { %v210_v13 = vpop.permute.xlu0 %209  ;;  %v137_v21 = vmul.f32 %v848_v43, %v82_v14 }
  0x9b   :  { %v251_v15 = vadd.f32 %v210_v13, %v139_v11  ;;  %592 = vmatprep.subr.mxu0 %v268_v12 }
  0x9c   :  { %593 = vmatpush3.msra.mxu0 %v268_v12 }
  0x9d   :  { %v267_v17 = vmax.f32 %v251_v15, 0.0  ;;  %v77_v19 = vpop.permute.xlu1 %76 }
  0x9e   :  { %v205_v18 = vpop.permute.xlu0 %204  ;;  %v136_v26 = vmul.f32 %v848_v43, %v77_v19 }
  0x9f   :  { %v250_v20 = vadd.f32 %v205_v18, %v138_v16  ;;  %594 = vmatprep.subr.mxu0 %v267_v17 }
  0xa0   :  { %595 = vmatpush3.msra.mxu0 %v267_v17 }
  0xa1   :  { %v266_v22 = vmax.f32 %v250_v20, 0.0  ;;  %v72_v24 = vpop.permute.xlu1 %71 }
  0xa2   :  { %v200_v23 = vpop.permute.xlu0 %199  ;;  %v135_v31 = vmul.f32 %v848_v43, %v72_v24 }
  0xa3   :  { %v249_v25 = vadd.f32 %v200_v23, %v137_v21  ;;  %596 = vmatprep.subr.mxu0 %v266_v22 }
  0xa4   :  { %597 = vmatpush3.msra.mxu0 %v266_v22 }
  0xa5   :  { %v265_v27 = vmax.f32 %v249_v25, 0.0  ;;  %v67_v29 = vpop.permute.xlu1 %66 }
  0xa6   :  { %v195_v28 = vpop.permute.xlu0 %194  ;;  %v134_v36 = vmul.f32 %v848_v43, %v67_v29 }
  0xa7   :  { %v248_v30 = vadd.f32 %v195_v28, %v136_v26  ;;  %598 = vmatprep.subr.mxu0 %v265_v27 }
  0xa8   :  { %599 = vmatpush3.msra.mxu0 %v265_v27 }
  0xa9   :  { %v264_v32 = vmax.f32 %v248_v30, 0.0  ;;  %v62_v34 = vpop.permute.xlu1 %61 }
  0xaa   :  { %v190_v33 = vpop.permute.xlu0 %189  ;;  %v133_v41 = vmul.f32 %v848_v43, %v62_v34 }
  0xab   :  { %v247_v35 = vadd.f32 %v190_v33, %v135_v31  ;;  %600 = vmatprep.subr.mxu0 %v264_v32 }
  0xac   :  { %601 = vmatpush3.msra.mxu0 %v264_v32 }
  0xad   :  { %v263_v37 = vmax.f32 %v247_v35, 0.0  ;;  %v57_v39 = vpop.permute.xlu1 %56 }
  0xae   :  { %v185_v38 = vpop.permute.xlu0 %184  ;;  %v132_v47 = vmul.f32 %v848_v43, %v57_v39 }
  0xaf   :  { %v246_v40 = vadd.f32 %v185_v38, %v134_v36  ;;  %602 = vmatprep.subr.mxu0 %v263_v37  ;;  %v443_v36 = vld [vmem:[%s898_s5] sm:$0x3]  ;;  %s653_s5 = scalar_lea.vmem %s540_s27, 32 }
  0xb0   :  { %603 = vmatpush3.msra.mxu0 %v263_v37  ;;  %p654_p0 = scmp.ne.s32.totalorder %s540_s27, %s653_s5  ;;  %p659_p2 = scmp.lt.s32.totalorder %s653_s5, %s653_s5 }
  0xb1   :  { %v262_v42 = vmax.f32 %v246_v40, 0.0  ;;  %v52_v45 = vpop.permute.xlu1 %51 }
  0xb2   :  { %v180_v44 = vpop.permute.xlu0 %179  ;;  %v131_v52 = vmul.f32 %v848_v43, %v52_v45  ;;  %p660_p3 = por %p659_p2, %p658_p1 }
  0xb3   :  { %v245_v46 = vadd.f32 %v180_v44, %v133_v41  ;;  %604 = vmatprep.subr.mxu0 %v262_v42  ;;  %v524_v44 = vlaneseq }
  0xb4   :  { %605 = vmatpush3.msra.mxu0 %v262_v42  ;;  %p661_p4 = pnand %p660_p3, %p654_p0 }
  0xb5   :  { %v261_v48 = vmax.f32 %v245_v46, 0.0  ;;  %v47_v50 = vpop.permute.xlu1 %46  ;;  %v525_v45 = vshrl.u32 %v524_v44, 7 }
  0xb6   :  { %v175_v49 = vpop.permute.xlu0 %174  ;;  %v130_v54 = vmul.f32 %v848_v43, %v47_v50  ;;  %v277_v43 = vld [vmem:[%s896_s3 + $0x18] sm:$0xff] }
  0xb7   :  { %v244_v51 = vadd.f32 %v175_v49, %v132_v47  ;;  %606 = vmatprep.subr.mxu0 %v261_v48  ;;  %vm526_vm2 = vcmp.lt.s32.totalorder %v525_v45, 1 }
  0xb8   :  { %607 = vmatpush3.msra.mxu0 %v261_v48 }
  0xb9   :  { %v260_v53 = vmax.f32 %v244_v51, 0.0  ;;  %v165_v56 = vpop.permute.xlu1 %164 }
  0xba   :  { %v170_v55 = vpop.permute.xlu0 %169  ;;  %v242_v58 = vadd.f32 %v165_v56, %v130_v54 }
  0xbb   :  { %v243_v57 = vadd.f32 %v170_v55, %v131_v52  ;;  %608 = vmatprep.subr.mxu0 %v260_v53 }
  0xbc   :  { %609 = vmatpush3.msra.mxu0 %v260_v53  ;;  %v258_v60 = vmax.f32 %v242_v58, 0.0 }
  0xbd   :  { %v259_v59 = vmax.f32 %v243_v57, 0.0  ;;  %v323_v8 = vpop.permute.xlu1 %322 }
  0xbe   :  { %v328_v6 = vpop.permute.xlu0 %327 }
  0xbf   :  { %610 = vmatprep.subr.mxu0 %v259_v59 }
  0xc0   :  { %611 = vmatpush3.msra.mxu0 %v259_v59 }
  0xc1   :  { %612 = vmatprep.subr.mxu0 %v258_v60  ;;  %v313_v13 = vpop.permute.xlu1 %312 }
  0xc2   :  { %613 = vmatpush3.msra.mxu0 %v258_v60  ;;  %v318_v11 = vpop.permute.xlu0 %317 }
  0xc3   :  { %615 = vmatmul.mubr.f32.vlgmr.msra.gmra.mxu0 %v275_v61 }
  0xc4   :  { %617 = vmatprep.mubr.f32.mxu0 %v276_v62 }
  0xc5   :  { %v303_v23 = vpop.permute.xlu1 %302 }
  0xc6   :  { %v308_v20 = vpop.permute.xlu0 %307 }
  0xc7   :  { %618 = vmatmul.mubr.f32.gmra.mxu0 %v277_v43 }
  0xc8   :  { %620 = vmatprep.mubr.f32.mxu0 %v278_v63 }
  0xc9   :  { %v293_v31 = vpop.permute.xlu1 %292 }
  0xca   :  { %v298_v28 = vpop.permute.xlu0 %297 }
  0xcb   :  { %621 = vmatmul.mubr.f32.gmra.mxu0 %v279_v0 }
  0xcc   :  { %623 = vmatprep.mubr.f32.mxu0 %v280_v1 }
  0xce   :  { %v448_v37 = vpop.permute.xlu0 %447 }
  0xcf   :  { %624 = vmatmul.mubr.f32.gmra.mxu0 %v281_v2 }
 0x183   :  { %v616_v4 = vpop.f32.mrf.mxu0 }
 0x184   :  { %v402_v29 = vadd.f32 %v616_v4, %v298_v28 }
 0x185   :  { %v396_v5 = vpop.f32.mrf.mxu0 }
 0x186   :  { %v397_v32 = vadd.f32 %v396_v5, %v293_v31  ;;  %v436_v34 = vmax.f32 %v402_v29, 0.0 }
 0x187   :  { %v619_v7 = vpop.f32.mrf.mxu0 }
 0x188   :  { %v412_v24 = vadd.f32 %v619_v7, %v308_v20  ;;  %v435_v35 = vmax.f32 %v397_v32, 0.0 }
 0x189   :  { %v406_v9 = vpop.f32.mrf.mxu0 }
 0x18a   :  { %v407_v26 = vadd.f32 %v406_v9, %v303_v23  ;;  %v438_v30 = vmax.f32 %v412_v24, 0.0 }
 0x18b   :  { %v622_v10 = vpop.f32.mrf.mxu0 }
 0x18c   :  { %v422_v17 = vadd.f32 %v622_v10, %v318_v11  ;;  %v437_v33 = vmax.f32 %v407_v26, 0.0 }
 0x18d   :  { %v416_v12 = vpop.f32.mrf.mxu0 }
 0x18e   :  { %v417_v21 = vadd.f32 %v416_v12, %v313_v13  ;;  %v440_v25 = vmax.f32 %v422_v17, 0.0 }
 0x18f   :  { %v625_v14 = vpop.f32.mrf.mxu0 }
 0x190   :  { %v432_v15 = vadd.f32 %v625_v14, %v328_v6  ;;  %v439_v27 = vmax.f32 %v417_v21, 0.0 }
 0x191   :  { %v426_v16 = vpop.f32.mrf.mxu0 }
 0x192   :  { %v442_v18 = vmax.f32 %v432_v15, 0.0  ;;  %v427_v19 = vadd.f32 %v426_v16, %v323_v8 }
 0x194   :  { %v441_v22 = vmax.f32 %v427_v19, 0.0  ;;  %627 = vmatpush3.msra.mxu1 %v442_v18 }
 0x195   :  { %628 = vmatprep.subr.mxu1 %v676_v3 }
 0x196   :  { %629 = vmatpush3.msra.mxu1 %v441_v22 }
 0x197   :  { %630 = vmatprep.subr.mxu1 %v676_v3 }
 0x198   :  { %631 = vmatpush3.msra.mxu1 %v440_v25 }
 0x199   :  { %632 = vmatprep.subr.mxu1 %v676_v3 }
 0x19a   :  { %633 = vmatpush3.msra.mxu1 %v439_v27 }
 0x19b   :  { %634 = vmatprep.subr.mxu1 %v676_v3 }
 0x19c   :  { %635 = vmatpush3.msra.mxu1 %v438_v30 }
 0x19d   :  { %636 = vmatprep.subr.mxu1 %v676_v3 }
 0x19e   :  { %637 = vmatpush3.msra.mxu1 %v437_v33 }
 0x19f   :  { %638 = vmatprep.subr.mxu1 %v676_v3 }
 0x1a0   :  { %639 = vmatpush3.msra.mxu1 %v436_v34 }
 0x1a1   :  { %640 = vmatprep.subr.mxu1 %v676_v3 }
 0x1a2   :  { %641 = vmatpush3.msra.mxu1 %v435_v35 }
 0x1a3   :  { %643 = vmatmul.mubr.msk.f32.vlgmr.msra.gmra.mxu1 %vm450_vm1, %v443_v36 }
 0x263   :  { %v520_v38 = vpop.f32.mrf.mxu1 }
 0x264   :  { %v521_v39 = vadd.f32 %v520_v38, %v448_v37 }
 0x265   :  { %v644_v40 = vpop.f32.mrf.mxu1 }
 0x266   :  { %v527_v41 = vmul.f32 0.5, %v521_v39 }
 0x268   :  { %v528_v42 = vmul.f32 1.442695, %v527_v41 }
 0x26a   :  { %651 = vpow2.f32 %v528_v42 }
 0x277   :  { %v652_v46 = vpop.eup %651 }
 0x278   :  { %v530_v47 = vsel %vm526_vm2, %v521_v39, %v652_v46 }
 0x279   :  { %532 = vst.msk [vmem:[#allocation2] sm:$0x3] %vm531_vm3, %v530_v47 }
 0x27a   :  { %664 = shalt.err (!%p661_p4)
}
 0x27b   :  { %542 = dma.vmem_to_hbm [thread:$0]  %s540_s27, 32, %s900_s7, [#allocation3]  }
 0x27c   :  { %673 = dma.done.wait [#allocation3], 32  }
 0x27d   :  { %674 = vsyncadd [#allocation3], 4294967264 }
 0x27e   :  { %546 = vsyncpa [#allocation3], 1 }

</bundles_post_ra>
